<compile_context>
chip_gen: v7x
topology: tpu7x:2x2x1
jax: 0.10.0
libtpu: 0.0.40
codegen_flags: <defaults>
</compile_context>

<pallas_src>
import functools

import jax
import jax.numpy as jnp
from jax import lax
from jax.experimental import pallas as pl
from jax.experimental.pallas import tpu as pltpu


# ----------------------------------------------------------------------------
# Kernel 1: tiled fused projections + relational sums.
#   Per row-tile of the flattened [B*L, H] activations:
#     Q    = (xq @ Wq^T + bq) / sqrt(d)            (scale folded in here)
#     Ksum = xk @ Wk^T + bk + nb + na + pK
#     Vsum = xk @ Wv^T + bv + nb + na + pV
#   Wk^T and Wv^T are fused into a single [H, 2H] matrix (one wide matmul).
#   Outputs are stored in the MXU operand dtype (bf16 on the fast path).
# ----------------------------------------------------------------------------
def proj_sum_kernel(xq_ref, xk_ref, nb_ref, na_ref, pk_ref, pv_ref,
                    wqT_ref, bq_ref, wkvT_ref, bkv_ref,
                    q_out_ref, ksum_out_ref, vsum_out_ref,
                    *, hidden, mxu_dtype, inv_scale):
    xq = xq_ref[...].astype(mxu_dtype)
    xk = xk_ref[...].astype(mxu_dtype)

    q = jnp.dot(xq, wqT_ref[...], preferred_element_type=jnp.float32) + bq_ref[...]
    kv = jnp.dot(xk, wkvT_ref[...], preferred_element_type=jnp.float32) + bkv_ref[...]

    rel = nb_ref[...] + na_ref[...]               # shared relational term (VPU, f32)
    q_out_ref[...] = (q * inv_scale).astype(q_out_ref.dtype)
    ksum_out_ref[...] = (kv[:, :hidden] + rel + pk_ref[...]).astype(ksum_out_ref.dtype)
    vsum_out_ref[...] = (kv[:, hidden:] + rel + pv_ref[...]).astype(vsum_out_ref.dtype)


# ----------------------------------------------------------------------------
# Kernel 2: relation-aware attention, all heads of one batch per program.
#   grid = (B, num_query_tiles).  Output block is a lane-dense [TQ, H] slab.
# ----------------------------------------------------------------------------
def attention_kernel(q_ref, ksum_ref, vsum_ref, mask_ref, o_ref,
                     *, head_num, head_size, mxu_dtype, exp_dtype, approx_recip):
    q = q_ref[0]           # [TQ, H]  (already scaled by 1/sqrt(d), mxu_dtype)
    ks = ksum_ref[0]       # [L,  H]
    vs = vsum_ref[0]       # [L,  H]

    pad = jnp.float32(-(2 ** 32) + 1)
    # Additive mask bias, built once per tile straight from the int8 mask
    # (hoisted out of the head loop; no int32 upcast, no per-head select).
    # NOTE: a row that is *entirely* masked degenerates to softmax(raw scores)
    # instead of the reference's uniform 1/L attention; such rows do not occur
    # with the causal/padding masks this module is used with.
    bias = jnp.where(mask_ref[...] != 0, pad, jnp.float32(0.0))     # [TQ, L]

    nt_dims = (((1,), (1,)), ((), ()))   # contract last dims: [TQ,d] x [L,d] -> [TQ,L]
    outs = []
    for h in range(head_num):            # static unroll over heads
        lo = h * head_size
        hi = lo + head_size
        # Collapsed score matmul (NT contraction, no XLU transpose):
        #   (Q/sqrt(d))_h @ (K + nb + na + pK)_h^T
        s = lax.dot_general(q[:, lo:hi], ks[:, lo:hi], nt_dims,
                            preferred_element_type=jnp.float32) + bias
        m = jnp.max(s, axis=-1, keepdims=True)
        p = jnp.exp((s - m).astype(exp_dtype))       # bf16 exp on v6e/v7x fast path
        denom = jnp.sum(p.astype(jnp.float32), axis=-1, keepdims=True)
        # Collapsed output matmul: P @ (V + nb + na + pV)_h.  Normalize the small
        # [TQ, d] accumulator instead of the [TQ, L] probabilities.
        acc = jnp.dot(p.astype(mxu_dtype), vs[:, lo:hi],
                      preferred_element_type=jnp.float32)
        outs.append(acc * pl.reciprocal(denom, approx=approx_recip))
        # TODO(synk): dropout on attention weights applied as identity (eval mode).

    # Single lane-dense [TQ, H] store.
    o_ref[0] = jnp.concatenate(outs, axis=-1).astype(o_ref.dtype)


# ----------------------------------------------------------------------------
# Per-generation VMEM budget (half of physical VMEM, capped), safe fallback.
# ----------------------------------------------------------------------------
def _vmem_budget_bytes(default=32 * 1024 * 1024):
    try:
        info = pltpu.get_tpu_info()
        vmem = getattr(info, "vmem_capacity_bytes", None) or 0
        if vmem > 0:
            return int(min(vmem // 2, 96 * 1024 * 1024))
    except Exception:
        pass
    return default


# ----------------------------------------------------------------------------
# Wrapper
# ----------------------------------------------------------------------------
def multi_head_attention(params, queries, keys, neighbor_matrix, neighAt_matrix,
                         abs_pos_K, abs_pos_V, attn_mask, *, head_num,
                         mxu_dtype=jnp.float32, exp_dtype=jnp.float32,
                         approx_recip=False):
    B, L, H = queries.shape
    assert H % head_num == 0
    d = H // head_num
    BL = B * L
    inv_scale = float(1.0 / (d ** 0.5))

    vmem_budget = _vmem_budget_bytes()
    big_vmem = vmem_budget >= 64 * 1024 * 1024        # 128-MiB-VMEM parts (v5e/v6e)
    TM = min(BL, 1024 if big_vmem else 512)           # stage-1 row tile
    TQ = min(L, 512 if big_vmem else 256)             # stage-2 query tile

    # Intermediates (Q, Ksum, Vsum) are emitted in the MXU operand dtype: halves
    # the HBM round trip and the stage-2 full-L K/V pipeline buffers when bf16.
    inter_dtype = mxu_dtype

    # ----- Stage 1: projections + relational sums (row-tiled, lane-dense) -----
    wqT = params["Wq"].T.astype(mxu_dtype)
    wkvT = jnp.concatenate([params["Wk"].T, params["Wv"].T], axis=1).astype(mxu_dtype)
    bq = params["bq"].reshape(1, H).astype(jnp.float32)
    bkv = jnp.concatenate([params["bk"], params["bv"]]).reshape(1, 2 * H).astype(jnp.float32)

    grid_m = pl.cdiv(BL, TM)
    row_spec = pl.BlockSpec((TM, H), lambda i: (i, 0))
    full2d = lambda shape: pl.BlockSpec(shape, lambda i: (0, 0))
    flat = lambda x: x.reshape(BL, H)
    out_sds = jax.ShapeDtypeStruct((BL, H), inter_dtype)

    q2d, ksum2d, vsum2d = pl.pallas_call(
        functools.partial(proj_sum_kernel, hidden=H, mxu_dtype=mxu_dtype,
                          inv_scale=inv_scale),
        out_shape=(out_sds, out_sds, out_sds),
        grid=(grid_m,),
        in_specs=[row_spec] * 6 + [full2d((H, H)), full2d((1, H)),
                                   full2d((H, 2 * H)), full2d((1, 2 * H))],
        out_specs=(row_spec, row_spec, row_spec),
        compiler_params=pltpu.CompilerParams(
            dimension_semantics=("parallel",),
            vmem_limit_bytes=vmem_budget),
    )(flat(queries), flat(keys), flat(neighbor_matrix), flat(neighAt_matrix),
      flat(abs_pos_K), flat(abs_pos_V), wqT, bq, wkvT, bkv)

    Q = q2d.reshape(B, L, H)
    Ksum = ksum2d.reshape(B, L, H)
    Vsum = vsum2d.reshape(B, L, H)

    # ----- Stage 2: query-tiled, heads-per-batch attention -----
    nq = pl.cdiv(L, TQ)
    mask_i8 = attn_mask.astype(jnp.int8)

    # TODO(synk): for very long L (>~4096) on v7x, add a kv grid axis with a
    # flash-style online softmax so VMEM stays independent of L instead of
    # holding full-L Ksum/Vsum blocks.
    out = pl.pallas_call(
        functools.partial(attention_kernel, head_num=head_num, head_size=d,
                          mxu_dtype=mxu_dtype, exp_dtype=exp_dtype,
                          approx_recip=approx_recip),
        out_shape=jax.ShapeDtypeStruct((B, L, H), jnp.float32),
        grid=(B, nq),
        in_specs=[pl.BlockSpec((1, TQ, H), lambda b, qi: (b, qi, 0)),   # Q tile
                  pl.BlockSpec((1, L, H), lambda b, qi: (b, 0, 0)),     # Ksum (full L)
                  pl.BlockSpec((1, L, H), lambda b, qi: (b, 0, 0)),     # Vsum (full L)
                  pl.BlockSpec((TQ, L), lambda b, qi: (qi, 0))],        # mask rows (int8)
        out_specs=pl.BlockSpec((1, TQ, H), lambda b, qi: (b, qi, 0)),
        compiler_params=pltpu.CompilerParams(
            dimension_semantics=("parallel", "parallel"),
            vmem_limit_bytes=vmem_budget),
    )(Q, Ksum, Vsum, mask_i8)

    return out


# ----------------------------------------------------------------------------
# Pure-JAX reference (mirrors the PyTorch forward exactly) for verification.
# ----------------------------------------------------------------------------
def _head_split(x, head_num):
    # torch.cat(torch.split(x, head_size, dim=2), dim=0): [B,L,H] -> [heads*B, L, d]
    return jnp.concatenate(jnp.split(x, head_num, axis=2), axis=0)


def _head_merge(x, head_num):
    # inverse: [heads*B, L, d] -> [B, L, H]
    return jnp.concatenate(jnp.split(x, head_num, axis=0), axis=2)


def reference(params, queries, keys, nb, na, pk, pv, mask, *, head_num):
    B, L, H = queries.shape
    d = H // head_num
    Q = queries @ params["Wq"].T + params["bq"]
    K = keys @ params["Wk"].T + params["bk"]
    V = keys @ params["Wv"].T + params["bv"]
    Q_ = _head_split(Q, head_num)
    K_ = _head_split(K, head_num)
    V_ = _head_split(V, head_num)
    nb_ = _head_split(nb, head_num)
    na_ = _head_split(na, head_num)
    pk_ = _head_split(pk, head_num)
    pv_ = _head_split(pv, head_num)
    t = lambda x: jnp.swapaxes(x, 1, 2)
    aw = Q_ @ t(K_) + Q_ @ t(nb_) + Q_ @ t(na_) + Q_ @ t(pk_)
    aw = aw / d ** 0.5
    aw = jnp.where(mask[None, :, :], jnp.float32(-(2 ** 32) + 1), aw)
    aw = jax.nn.softmax(aw, axis=-1)
    out = aw @ V_ + aw @ nb_ + aw @ na_ + aw @ pv_
    return _head_merge(out, head_num)


if __name__ == "__main__":
    B, L, H, head_num = 2, 8, 32, 4
    key = jax.random.PRNGKey(0)
    ks = jax.random.split(key, 12)

    params = {
        "Wq": 0.05 * jax.random.normal(ks[0], (H, H), jnp.float32),
        "bq": 0.05 * jax.random.normal(ks[1], (H,), jnp.float32),
        "Wk": 0.05 * jax.random.normal(ks[2], (H, H), jnp.float32),
        "bk": 0.05 * jax.random.normal(ks[3], (H,), jnp.float32),
        "Wv": 0.05 * jax.random.normal(ks[4], (H, H), jnp.float32),
        "bv": 0.05 * jax.random.normal(ks[5], (H,), jnp.float32),
    }

    queries = jax.random.normal(ks[6], (B, L, H), jnp.float32)
    keys = jax.random.normal(ks[7], (B, L, H), jnp.float32)
    neighbor_matrix = jax.random.normal(ks[8], (B, L, H), jnp.float32)
    neighAt_matrix = jax.random.normal(ks[9], (B, L, H), jnp.float32)
    abs_pos_K = jax.random.normal(ks[10], (B, L, H), jnp.float32)
    abs_pos_V = jax.random.normal(ks[11], (B, L, H), jnp.float32)
    # causal-style mask: True above the diagonal -> masked out
    attn_mask = ~jnp.tril(jnp.ones((L, L), dtype=bool))

    ref = reference(params, queries, keys, neighbor_matrix, neighAt_matrix,
                    abs_pos_K, abs_pos_V, attn_mask, head_num=head_num)

    # Exact path (f32 intermediates / MXU operands / exp, exact reciprocal).
    out = multi_head_attention(params, queries, keys, neighbor_matrix,
                               neighAt_matrix, abs_pos_K, abs_pos_V, attn_mask,
                               head_num=head_num)
    out = jax.block_until_ready(out)
    assert out.shape == (B, L, H)
    assert jnp.allclose(out, ref, rtol=2e-4, atol=2e-4)

    # TPU-optimized path (bf16 intermediates + bf16 MXU operands + bf16 exp +
    # EUP approx reciprocal, as recommended for v6e/v7x) — loose tolerance.
    out_fast = multi_head_attention(params, queries, keys, neighbor_matrix,
                                    neighAt_matrix, abs_pos_K, abs_pos_V,
                                    attn_mask, head_num=head_num,
                                    mxu_dtype=jnp.bfloat16,
                                    exp_dtype=jnp.bfloat16,
                                    approx_recip=True)
    out_fast = jax.block_until_ready(out_fast)
    assert jnp.allclose(out_fast, ref, rtol=1e-1, atol=1e-1)

    print("KERNEL_OK")
</pallas_src>

<mosaic_0001>
module attributes {stable_mosaic.version = 11 : i64} {
  func.func @proj_sum_kernel(%arg0: i32, %arg1: memref<16x32xf32, #tpu.memory_space<vmem>>, %arg2: memref<16x32xf32, #tpu.memory_space<vmem>>, %arg3: memref<16x32xf32, #tpu.memory_space<vmem>>, %arg4: memref<16x32xf32, #tpu.memory_space<vmem>>, %arg5: memref<16x32xf32, #tpu.memory_space<vmem>>, %arg6: memref<16x32xf32, #tpu.memory_space<vmem>>, %arg7: memref<32x32xf32, #tpu.memory_space<vmem>>, %arg8: memref<1x32xf32, #tpu.memory_space<vmem>>, %arg9: memref<32x64xf32, #tpu.memory_space<vmem>>, %arg10: memref<1x64xf32, #tpu.memory_space<vmem>>, %arg11: memref<16x32xf32, #tpu.memory_space<vmem>>, %arg12: memref<16x32xf32, #tpu.memory_space<vmem>>, %arg13: memref<16x32xf32, #tpu.memory_space<vmem>>) attributes {dimension_semantics = [#tpu.dimension_semantics<parallel>], iteration_bounds = array<i64: 1>, scalar_prefetch = 0 : i64, scratch_operands = 0 : i64, tpu.core_type = #tpu.core_type<tc>, window_params = [{transform_indices = @transform_0, window_bounds = array<i64: 16, 32>}, {transform_indices = @transform_1, window_bounds = array<i64: 16, 32>}, {transform_indices = @transform_2, window_bounds = array<i64: 16, 32>}, {transform_indices = @transform_3, window_bounds = array<i64: 16, 32>}, {transform_indices = @transform_4, window_bounds = array<i64: 16, 32>}, {transform_indices = @transform_5, window_bounds = array<i64: 16, 32>}, {pipeline_mode = #tpu.pipeline_mode<synchronous>, transform_indices = @transform_6, window_bounds = array<i64: 32, 32>}, {pipeline_mode = #tpu.pipeline_mode<synchronous>, transform_indices = @transform_7, window_bounds = array<i64: 1, 32>}, {pipeline_mode = #tpu.pipeline_mode<synchronous>, transform_indices = @transform_8, window_bounds = array<i64: 32, 64>}, {pipeline_mode = #tpu.pipeline_mode<synchronous>, transform_indices = @transform_9, window_bounds = array<i64: 1, 64>}, {transform_indices = @transform_10, window_bounds = array<i64: 16, 32>}, {transform_indices = @transform_11, window_bounds = array<i64: 16, 32>}, {transform_indices = @transform_12, window_bounds = array<i64: 16, 32>}]} {
    %c0 = arith.constant 0 : index
    %c0_0 = arith.constant 0 : index
    %0 = vector.load %arg1[%c0, %c0_0] : memref<16x32xf32, #tpu.memory_space<vmem>>, vector<16x32xf32>
    %c0_1 = arith.constant 0 : index
    %c0_2 = arith.constant 0 : index
    %1 = vector.load %arg2[%c0_1, %c0_2] : memref<16x32xf32, #tpu.memory_space<vmem>>, vector<16x32xf32>
    %c0_3 = arith.constant 0 : index
    %c0_4 = arith.constant 0 : index
    %2 = vector.load %arg7[%c0_3, %c0_4] : memref<32x32xf32, #tpu.memory_space<vmem>>, vector<32x32xf32>
    %cst = arith.constant dense<0.000000e+00> : vector<16x32xf32>
    %3 = tpu.matmul %0, %2, %cst {dimension_numbers = #tpu.dot_dimension_numbers<[1], [0], [0], [1], [0, 0, 1, 1], [], []>} : vector<16x32xf32>, vector<32x32xf32>, vector<16x32xf32> -> vector<16x32xf32>
    %c0_5 = arith.constant 0 : index
    %c0_6 = arith.constant 0 : index
    %4 = vector.load %arg8[%c0_5, %c0_6] : memref<1x32xf32, #tpu.memory_space<vmem>>, vector<1x32xf32>
    %5 = vector.broadcast %4 : vector<1x32xf32> to vector<16x32xf32>
    %6 = arith.addf %3, %5 : vector<16x32xf32>
    %c0_7 = arith.constant 0 : index
    %c0_8 = arith.constant 0 : index
    %7 = vector.load %arg9[%c0_7, %c0_8] : memref<32x64xf32, #tpu.memory_space<vmem>>, vector<32x64xf32>
    %cst_9 = arith.constant dense<0.000000e+00> : vector<16x64xf32>
    %8 = tpu.matmul %1, %7, %cst_9 {dimension_numbers = #tpu.dot_dimension_numbers<[1], [0], [0], [1], [0, 0, 1, 1], [], []>} : vector<16x32xf32>, vector<32x64xf32>, vector<16x64xf32> -> vector<16x64xf32>
    %c0_10 = arith.constant 0 : index
    %c0_11 = arith.constant 0 : index
    %9 = vector.load %arg10[%c0_10, %c0_11] : memref<1x64xf32, #tpu.memory_space<vmem>>, vector<1x64xf32>
    %10 = vector.broadcast %9 : vector<1x64xf32> to vector<16x64xf32>
    %11 = arith.addf %8, %10 : vector<16x64xf32>
    %c0_12 = arith.constant 0 : index
    %c0_13 = arith.constant 0 : index
    %12 = vector.load %arg3[%c0_12, %c0_13] : memref<16x32xf32, #tpu.memory_space<vmem>>, vector<16x32xf32>
    %c0_14 = arith.constant 0 : index
    %c0_15 = arith.constant 0 : index
    %13 = vector.load %arg4[%c0_14, %c0_15] : memref<16x32xf32, #tpu.memory_space<vmem>>, vector<16x32xf32>
    %14 = arith.addf %12, %13 : vector<16x32xf32>
    %cst_16 = arith.constant 0.353553385 : f32
    %15 = vector.broadcast %cst_16 : f32 to vector<16x32xf32>
    %16 = arith.mulf %6, %15 : vector<16x32xf32>
    %c0_17 = arith.constant 0 : index
    %c0_18 = arith.constant 0 : index
    %17 = vector.load %arg11[%c0_17, %c0_18] : memref<16x32xf32, #tpu.memory_space<vmem>>, vector<16x32xf32>
    tpu.vector_store %arg11[%c0_17, %c0_18], %16 {strides = array<i32>} : memref<16x32xf32, #tpu.memory_space<vmem>>, vector<16x32xf32>,
    %18 = vector.extract_strided_slice %11 {offsets = [0, 0], sizes = [16, 32], strides = [1, 1]} : vector<16x64xf32> to vector<16x32xf32>
    %19 = arith.addf %18, %14 : vector<16x32xf32>
    %c0_19 = arith.constant 0 : index
    %c0_20 = arith.constant 0 : index
    %20 = vector.load %arg5[%c0_19, %c0_20] : memref<16x32xf32, #tpu.memory_space<vmem>>, vector<16x32xf32>
    %21 = arith.addf %19, %20 : vector<16x32xf32>
    %c0_21 = arith.constant 0 : index
    %c0_22 = arith.constant 0 : index
    %22 = vector.load %arg12[%c0_21, %c0_22] : memref<16x32xf32, #tpu.memory_space<vmem>>, vector<16x32xf32>
    tpu.vector_store %arg12[%c0_21, %c0_22], %21 {strides = array<i32>} : memref<16x32xf32, #tpu.memory_space<vmem>>, vector<16x32xf32>,
    %23 = vector.extract_strided_slice %11 {offsets = [0, 32], sizes = [16, 32], strides = [1, 1]} : vector<16x64xf32> to vector<16x32xf32>
    %24 = arith.addf %23, %14 : vector<16x32xf32>
    %c0_23 = arith.constant 0 : index
    %c0_24 = arith.constant 0 : index
    %25 = vector.load %arg6[%c0_23, %c0_24] : memref<16x32xf32, #tpu.memory_space<vmem>>, vector<16x32xf32>
    %26 = arith.addf %24, %25 : vector<16x32xf32>
    %c0_25 = arith.constant 0 : index
    %c0_26 = arith.constant 0 : index
    %27 = vector.load %arg13[%c0_25, %c0_26] : memref<16x32xf32, #tpu.memory_space<vmem>>, vector<16x32xf32>
    tpu.vector_store %arg13[%c0_25, %c0_26], %26 {strides = array<i32>} : memref<16x32xf32, #tpu.memory_space<vmem>>, vector<16x32xf32>,
    return
  }
  func.func @transform_0(%arg0: i32) -> (i32, i32) {
    %c0_i32 = arith.constant 0 : i32
    %c0_i32_0 = arith.constant 0 : i32
    return %arg0, %c0_i32 : i32, i32
  }
  func.func @transform_1(%arg0: i32) -> (i32, i32) {
    %c0_i32 = arith.constant 0 : i32
    %c0_i32_0 = arith.constant 0 : i32
    return %arg0, %c0_i32 : i32, i32
  }
  func.func @transform_2(%arg0: i32) -> (i32, i32) {
    %c0_i32 = arith.constant 0 : i32
    %c0_i32_0 = arith.constant 0 : i32
    return %arg0, %c0_i32 : i32, i32
  }
  func.func @transform_3(%arg0: i32) -> (i32, i32) {
    %c0_i32 = arith.constant 0 : i32
    %c0_i32_0 = arith.constant 0 : i32
    return %arg0, %c0_i32 : i32, i32
  }
  func.func @transform_4(%arg0: i32) -> (i32, i32) {
    %c0_i32 = arith.constant 0 : i32
    %c0_i32_0 = arith.constant 0 : i32
    return %arg0, %c0_i32 : i32, i32
  }
  func.func @transform_5(%arg0: i32) -> (i32, i32) {
    %c0_i32 = arith.constant 0 : i32
    %c0_i32_0 = arith.constant 0 : i32
    return %arg0, %c0_i32 : i32, i32
  }
  func.func @transform_6(%arg0: i32) -> (i32, i32) {
    %c0_i32 = arith.constant 0 : i32
    %c0_i32_0 = arith.constant 0 : i32
    %c0_i32_1 = arith.constant 0 : i32
    return %c0_i32, %c0_i32_0 : i32, i32
  }
  func.func @transform_7(%arg0: i32) -> (i32, i32) {
    %c0_i32 = arith.constant 0 : i32
    %c0_i32_0 = arith.constant 0 : i32
    %c0_i32_1 = arith.constant 0 : i32
    return %c0_i32, %c0_i32_0 : i32, i32
  }
  func.func @transform_8(%arg0: i32) -> (i32, i32) {
    %c0_i32 = arith.constant 0 : i32
    %c0_i32_0 = arith.constant 0 : i32
    %c0_i32_1 = arith.constant 0 : i32
    return %c0_i32, %c0_i32_0 : i32, i32
  }
  func.func @transform_9(%arg0: i32) -> (i32, i32) {
    %c0_i32 = arith.constant 0 : i32
    %c0_i32_0 = arith.constant 0 : i32
    %c0_i32_1 = arith.constant 0 : i32
    return %c0_i32, %c0_i32_0 : i32, i32
  }
  func.func @transform_10(%arg0: i32) -> (i32, i32) {
    %c0_i32 = arith.constant 0 : i32
    %c0_i32_0 = arith.constant 0 : i32
    return %arg0, %c0_i32 : i32, i32
  }
  func.func @transform_11(%arg0: i32) -> (i32, i32) {
    %c0_i32 = arith.constant 0 : i32
    %c0_i32_0 = arith.constant 0 : i32
    return %arg0, %c0_i32 : i32, i32
  }
  func.func @transform_12(%arg0: i32) -> (i32, i32) {
    %c0_i32 = arith.constant 0 : i32
    %c0_i32_0 = arith.constant 0 : i32
    return %arg0, %c0_i32 : i32, i32
  }
}

</mosaic_0001>

<bundles_post_ra>
// kernel: tpu_custom_call.1
= control target key start
LH: loop header
LB: loop body
LE: loop exit
PB: predicated region body
PF: predicated region fallthrough
CT: control target
= control target key end

     0   :  { %18 = vsyncpa [#allocation3], 0  ;;  %s1006_s0 = inlined_call_operand.hbm [shape: f32[16,32], index: 0, kind: input, shape index: {}]   ;;  %s1007_s1 = inlined_call_operand.hbm [shape: f32[16,32], index: 1, kind: input, shape index: {}]   ;;  %s1008_s2 = inlined_call_operand.hbm [shape: f32[16,32], index: 2, kind: input, shape index: {}]   ;;  %s1009_s3 = inlined_call_operand.hbm [shape: f32[16,32], index: 3, kind: input, shape index: {}]   ;;  %s1010_s4 = inlined_call_operand.hbm [shape: f32[16,32], index: 4, kind: input, shape index: {}]   ;;  %s1011_s5 = inlined_call_operand.vmem [shape: f32[16,32], index: 5, kind: input, shape index: {}]   ;;  %s1012_s6 = inlined_call_operand.hbm [shape: f32[32,32], index: 6, kind: input, shape index: {}]   ;;  %s1013_s7 = inlined_call_operand.vmem [shape: f32[1,32], index: 7, kind: input, shape index: {}]   ;;  %s1014_s8 = inlined_call_operand.hbm [shape: f32[32,64], index: 8, kind: input, shape index: {}]   ;;  %s1015_s9 = inlined_call_operand.vmem [shape: f32[1,64], index: 9, kind: input, shape index: {}]   ;;  %s1016_s10 = inlined_call_operand.hbm [shape: f32[16,32], index: 10, kind: output, shape index: {0}]   ;;  %s1017_s11 = inlined_call_operand.hbm [shape: f32[16,32], index: 11, kind: output, shape index: {1}]   ;;  %s1018_s12 = inlined_call_operand.hbm [shape: f32[16,32], index: 12, kind: output, shape index: {2}]  }
   0x1   :  { %19 = vsyncpa [#allocation6], 0 }
   0x2   :  { %20 = vsyncpa [#allocation9], 0 }
   0x3   :  { %21 = vsyncpa [#allocation12], 0 }
   0x4   :  { %22 = vsyncpa [#allocation4], 0 }
   0x5   :  { %23 = vsyncpa [#allocation16], 0  ;;  %s727_s21 = smov [#allocation5]   ;;  %s728_s23 = smov [#allocation8]  }
   0x6   :  { %s41_s22 = sshll.u32 %s727_s21, 4  ;;  %s65_s24 = sshll.u32 %s728_s23, 4  ;;  %s42_s22 = int_to_ptr.vmem [resolvable:$true] %s41_s22  ;;  %s806_s24 = int_to_ptr.vmem [resolvable:$true] %s65_s24 }
   0x7   :  { %s495_s27 = scalar_lea.hbm %s1007_s1, 256 }
   0x8   :  { %p496_p0 = scmp.ne.s32.totalorder %s1007_s1, %s495_s27  ;;  %p499_p1 = scmp.lt.u32.totalorder %s495_s27, %s1007_s1 }
   0xa   :  { %p501_p2 = pnand %p499_p1, %p496_p0 }
   0xc   :  { %504 = shalt.err (!%p501_p2)
}
   0xd   :  { %s505_s14 = scalar_lea.vmem %s42_s22, 256  ;;  %p510_p4 = scmp.lt.s32.totalorder %s42_s22, %s42_s22 }
   0xe   :  { %p506_p3 = scmp.ne.s32.totalorder %s42_s22, %s505_s14  ;;  %p511_p5 = scmp.lt.s32.totalorder %s505_s14, %s505_s14 }
  0x10   :  { %p512_p6 = por %p511_p5, %p510_p4 }
  0x12   :  { %p513_p7 = pnand %p512_p6, %p506_p3 }
  0x14   :  { %516 = shalt.err (!%p513_p7)
}
  0x15   :  { %s729_s15 = smov 128   ;;  %s730_s16 = smov 8  }
  0x16   :  { %47 = dma.hbm_to_vmem [thread:$0]  %s1007_s1, 256, %s42_s22, [#allocation6], %s729_s15, %s729_s15, %s730_s16  }
  0x17   :  { %s517_s21 = scalar_lea.hbm %s1009_s3, 256 }
  0x18   :  { %p518_p8 = scmp.ne.s32.totalorder %s1009_s3, %s517_s21  ;;  %p521_p9 = scmp.lt.u32.totalorder %s517_s21, %s1009_s3 }
  0x1a   :  { %p523_p10 = pnand %p521_p9, %p518_p8 }
  0x1c   :  { %526 = shalt.err (!%p523_p10)
}
  0x1d   :  { %s527_s28 = scalar_lea.vmem %s806_s24, 256  ;;  %p532_p12 = scmp.lt.s32.totalorder %s806_s24, %s806_s24 }
  0x1e   :  { %p528_p11 = scmp.ne.s32.totalorder %s806_s24, %s527_s28  ;;  %p533_p13 = scmp.lt.s32.totalorder %s527_s28, %s527_s28 }
  0x20   :  { %p534_p0 = por %p533_p13, %p532_p12 }
  0x22   :  { %p535_p1 = pnand %p534_p0, %p528_p11 }
  0x24   :  { %538 = shalt.err (!%p535_p1)
}
  0x25   :  { %71 = dma.hbm_to_vmem [thread:$0]  %s1009_s3, 256, %s806_s24, [#allocation9], %s729_s15, %s729_s15, %s730_s16  }
  0x26   :  { %s731_s29 = smov [#allocation11]   ;;  %s732_s13 = smov [#allocation2]  }
  0x27   :  { %s91_s30 = sshll.u32 %s731_s29, 4  ;;  %s29_s14 = sshll.u32 %s732_s13, 4  ;;  %s92_s30 = int_to_ptr.vmem [resolvable:$true] %s91_s30  ;;  %s843_s14 = int_to_ptr.vmem [resolvable:$true] %s29_s14 }
  0x28   :  { %s539_s19 = scalar_lea.hbm %s1012_s6, 512 }
  0x29   :  { %p540_p2 = scmp.ne.s32.totalorder %s1012_s6, %s539_s19  ;;  %p543_p3 = scmp.lt.u32.totalorder %s539_s19, %s1012_s6 }
  0x2b   :  { %p545_p4 = pnand %p543_p3, %p540_p2 }
  0x2d   :  { %548 = shalt.err (!%p545_p4)
}
  0x2e   :  { %s549_s3 = scalar_lea.vmem %s92_s30, 512  ;;  %p554_p6 = scmp.lt.s32.totalorder %s92_s30, %s92_s30 }
  0x2f   :  { %p550_p5 = scmp.ne.s32.totalorder %s92_s30, %s549_s3  ;;  %p555_p7 = scmp.lt.s32.totalorder %s549_s3, %s549_s3 }
  0x31   :  { %p556_p8 = por %p555_p7, %p554_p6 }
  0x33   :  { %p557_p9 = pnand %p556_p8, %p550_p5 }
  0x35   :  { %560 = shalt.err (!%p557_p9)
}
  0x36   :  { %97 = dma.hbm_to_vmem [thread:$0]  %s1012_s6, 512, %s92_s30, [#allocation12], %s729_s15, %s729_s15, %s730_s16  }
  0x37   :  { %s561_s1 = scalar_lea.hbm %s1006_s0, 256 }
  0x38   :  { %p562_p10 = scmp.ne.s32.totalorder %s1006_s0, %s561_s1  ;;  %p565_p11 = scmp.lt.u32.totalorder %s561_s1, %s1006_s0 }
  0x3a   :  { %p567_p12 = pnand %p565_p11, %p562_p10 }
  0x3c   :  { %570 = shalt.err (!%p567_p12)
}
  0x3d   :  { %s571_s18 = scalar_lea.vmem %s843_s14, 256  ;;  %p576_p0 = scmp.lt.s32.totalorder %s843_s14, %s843_s14 }
  0x3e   :  { %p572_p13 = scmp.ne.s32.totalorder %s843_s14, %s571_s18  ;;  %p577_p1 = scmp.lt.s32.totalorder %s571_s18, %s571_s18 }
  0x40   :  { %p578_p2 = por %p577_p1, %p576_p0 }
  0x42   :  { %p579_p3 = pnand %p578_p2, %p572_p13 }
  0x44   :  { %582 = shalt.err (!%p579_p3)
}
  0x45   :  { %35 = dma.hbm_to_vmem [thread:$0]  %s1006_s0, 256, %s843_s14, [#allocation3], %s729_s15, %s729_s15, %s730_s16  }
  0x46   :  { %s733_s19 = smov [#allocation7]   ;;  %s734_s21 = smov [#allocation10]  }
  0x47   :  { %s53_s20 = sshll.u32 %s733_s19, 4  ;;  %s77_s23 = sshll.u32 %s734_s21, 4  ;;  %s54_s20 = int_to_ptr.vmem [resolvable:$true] %s53_s20  ;;  %s880_s23 = int_to_ptr.vmem [resolvable:$true] %s77_s23 }
  0x48   :  { %s583_s24 = scalar_lea.hbm %s1008_s2, 256 }
  0x49   :  { %p584_p4 = scmp.ne.s32.totalorder %s1008_s2, %s583_s24  ;;  %p587_p5 = scmp.lt.u32.totalorder %s583_s24, %s1008_s2 }
  0x4b   :  { %p589_p6 = pnand %p587_p5, %p584_p4 }
  0x4d   :  { %592 = shalt.err (!%p589_p6)
}
  0x4e   :  { %s593_s0 = scalar_lea.vmem %s54_s20, 256  ;;  %p598_p8 = scmp.lt.s32.totalorder %s54_s20, %s54_s20 }
  0x4f   :  { %p594_p7 = scmp.ne.s32.totalorder %s54_s20, %s593_s0  ;;  %p599_p9 = scmp.lt.s32.totalorder %s593_s0, %s593_s0 }
  0x51   :  { %p600_p10 = por %p599_p9, %p598_p8 }
  0x53   :  { %p601_p11 = pnand %p600_p10, %p594_p7 }
  0x55   :  { %604 = shalt.err (!%p601_p11)
}
  0x56   :  { %59 = dma.hbm_to_vmem [thread:$0]  %s1008_s2, 256, %s54_s20, [#allocation6], %s729_s15, %s729_s15, %s730_s16  }
  0x57   :  { %s605_s17 = scalar_lea.hbm %s1010_s4, 256 }
  0x58   :  { %p606_p12 = scmp.ne.s32.totalorder %s1010_s4, %s605_s17  ;;  %p609_p13 = scmp.lt.u32.totalorder %s605_s17, %s1010_s4 }
  0x5a   :  { %p611_p0 = pnand %p609_p13, %p606_p12 }
  0x5c   :  { %614 = shalt.err (!%p611_p0)
}
  0x5d   :  { %s615_s21 = scalar_lea.vmem %s880_s23, 256  ;;  %p620_p2 = scmp.lt.s32.totalorder %s880_s23, %s880_s23 }
  0x5e   :  { %p616_p1 = scmp.ne.s32.totalorder %s880_s23, %s615_s21  ;;  %p621_p3 = scmp.lt.s32.totalorder %s615_s21, %s615_s21 }
  0x60   :  { %p622_p4 = por %p621_p3, %p620_p2 }
  0x62   :  { %p623_p5 = pnand %p622_p4, %p616_p1 }
  0x64   :  { %626 = shalt.err (!%p623_p5)
}
  0x65   :  { %83 = dma.hbm_to_vmem [thread:$0]  %s1010_s4, 256, %s880_s23, [#allocation9], %s729_s15, %s729_s15, %s730_s16  }
  0x66   :  { %s735_s25 = smov [#allocation13]   ;;  %s627_s27 = scalar_lea.hbm %s1014_s8, 512 }
  0x67   :  { %s105_s3 = sshll.u32 %s735_s25, 4  ;;  %p628_p6 = scmp.ne.s32.totalorder %s1014_s8, %s627_s27  ;;  %s106_s3 = int_to_ptr.vmem [resolvable:$true] %s105_s3 }
  0x68   :  { %p631_p7 = scmp.lt.u32.totalorder %s627_s27, %s1014_s8 }
  0x6a   :  { %p633_p8 = pnand %p631_p7, %p628_p6 }
  0x6c   :  { %636 = shalt.err (!%p633_p8)
}
  0x6d   :  { %s637_s22 = scalar_lea.vmem %s106_s3, 512  ;;  %p642_p10 = scmp.lt.s32.totalorder %s106_s3, %s106_s3 }
  0x6e   :  { %p638_p9 = scmp.ne.s32.totalorder %s106_s3, %s637_s22  ;;  %p643_p11 = scmp.lt.s32.totalorder %s637_s22, %s637_s22 }
  0x70   :  { %p644_p12 = por %p643_p11, %p642_p10 }
  0x72   :  { %p645_p13 = pnand %p644_p12, %p638_p9 }
  0x74   :  { %648 = shalt.err (!%p645_p13)
}
  0x75   :  { %111 = dma.hbm_to_vmem [thread:$0]  %s1014_s8, 512, %s106_s3, [#allocation12], %s729_s15, %s729_s15, %s730_s16  }
  0x76   :  { %715 = dma.done.wait [#allocation3], 256  }
  0x77   :  { %716 = vsyncadd [#allocation3], 4294967040 }
  0x78   :  { %717 = dma.done.wait [#allocation6], 512  }
  0x79   :  { %718 = vsyncadd [#allocation6], 4294966784 }
  0x7a   :  { %719 = dma.done.wait [#allocation9], 512  }
  0x7b   :  { %720 = vsyncadd [#allocation9], 4294966784 }
  0x7c   :  { %721 = dma.done.wait [#allocation12], 1024  }
  0x7d   :  { %722 = vsyncadd [#allocation12], 4294966272  ;;  %vm150_vm0 = vcmask 261120   ;;  %v232_v0 = vld [vmem:[#allocation13] sm:$0xff]  ;;  %v233_v1 = vld [vmem:[#allocation13 + $0x8] sm:$0xff]  ;;  %s736_s13 = smov 32  }
  0x7e   :  { %v234_v2 = vld [vmem:[#allocation13 + $0x10] sm:$0xff]  ;;  %v473_v3 = vpack.c.bf16 %v233_v1, %v232_v0  ;;  %v235_v4 = vld [vmem:[#allocation13 + $0x18] sm:$0xff]  ;;  %v137_v5 = vld [vmem:[#allocation5] sm:$0xff]  ;;  %s737_s21 = smov [#allocation15]  }
  0x7f   :  { %v477_v6 = vpack.c.bf16 %v235_v4, %v234_v2  ;;  %462 = vmatprep.mubr.msk.f32.mxu1 %vm150_vm0, %v137_v5  ;;  %v324_v7 = vld [vmem:[#allocation7] sm:$0xff]  ;;  %v326_v8 = vld [vmem:[#allocation8] sm:$0xff]  ;;  %v325_v11 = vld [vmem:[#allocation7 + $0x8] sm:$0xff]  ;;  %s391_s2 = sshll.u32 %s737_s21, 4  ;;  %s392_s2 = int_to_ptr.vmem [resolvable:$true] %s391_s2 }
  0x80   :  { %v352_v9 = vld [vmem:[%s1011_s5] sm:$0xff]  ;;  %474 = vmatprep.subr.bf16.mxu1 %v473_v3  ;;  %v328_v10 = vadd.f32 %v326_v8, %v324_v7  ;;  %v327_v12 = vld [vmem:[#allocation8 + $0x8] sm:$0xff]  ;;  %v353_v13 = vld [vmem:[%s1011_s5 + $0x8] sm:$0xff]  ;;  %s649_s25 = scalar_lea.vmem %s392_s2, 256  ;;  %p654_p1 = scmp.lt.s32.totalorder %s392_s2, %s392_s2 }
  0x81   :  { %356 = vrot.lane.b32.xlu1 %v352_v9, %s736_s13  ;;  %476 = vmatpush3.bf16.msra.mxu1 %v473_v3  ;;  %v139_v14 = vld [vmem:[#allocation11] sm:$0xff]  ;;  %v140_v15 = vld [vmem:[#allocation11 + $0x8] sm:$0xff]  ;;  %v141_v16 = vld [vmem:[#allocation11 + $0x10] sm:$0xff]  ;;  %v329_v17 = vadd.f32 %v327_v12, %v325_v11  ;;  %p650_p0 = scmp.ne.s32.totalorder %s392_s2, %s649_s25  ;;  %p655_p2 = scmp.lt.s32.totalorder %s649_s25, %s649_s25 }
  0x82   :  { %478 = vmatprep.subr.bf16.mxu1 %v477_v6  ;;  %344 = vrot.lane.b32.xlu0 %v328_v10, %s736_s13  ;;  %v465_v18 = vpack.c.bf16 %v140_v15, %v139_v14  ;;  %v142_v19 = vld [vmem:[#allocation11 + $0x18] sm:$0xff]  ;;  %v135_v20 = vld [vmem:[#allocation2] sm:$0xff]  ;;  %v138_v22 = vld [vmem:[#allocation5 + $0x8] sm:$0xff] }
  0x83   :  { %v469_v21 = vpack.c.bf16 %v142_v19, %v141_v16  ;;  %451 = vmatprep.mubr.msk.f32.mxu0 %vm150_vm0, %v135_v20  ;;  %v136_v23 = vld [vmem:[#allocation2 + $0x8] sm:$0xff]  ;;  %v428_v26 = vld [vmem:[%s1015_s9] ss:$0 sm:$0xff]  ;;  %s738_s9 = smov [#allocation14]   ;;  %p656_p3 = por %p655_p2, %p654_p1 }
  0x84   :  { %466 = vmatprep.subr.bf16.mxu0 %v465_v18  ;;  %v337_v31 = vld [vmem:[#allocation10 + $0x8] sm:$0xff]  ;;  %v425_v34 = vld [vmem:[%s1013_s7] ss:$0 sm:$0xff]  ;;  %s379_s20 = sshll.u32 %s738_s9, 4  ;;  %s739_s7 = smov 96   ;;  %s950_s20 = int_to_ptr.vmem [resolvable:$true] %s379_s20 }
  0x85   :  { %358 = vrot.lane.b32.xlu1 %v353_v13, %s736_s13  ;;  %480 = vmatpush3.bf16.msra.mxu1 %v477_v6  ;;  %v336_v36 = vld [vmem:[#allocation10] sm:$0xff]  ;;  %p657_p4 = pnand %p656_p3, %p650_p0 }
  0x86   :  { %468 = vmatpush3.bf16.msra.mxu0 %v465_v18  ;;  %346 = vrot.lane.b32.xlu0 %v329_v17, %s736_s13 }
  0x87   :  { %470 = vmatprep.subr.bf16.mxu0 %v469_v21 }
  0x88   :  { %463 = vmatmul.mubr.msk.f32.vlgmr.msra.gmra.mrb[0].mxu1 %vm150_vm0, %v138_v22 }
  0x8a   :  { %472 = vmatpush3.bf16.msra.mxu0 %v469_v21 }
  0x8d   :  { %452 = vmatmul.mubr.msk.f32.vlgmr.msra.gmra.mrb[0].mxu0 %vm150_vm0, %v136_v23 }
  0xf3   :  { %v357_v25 = vpop.permute.xlu1 %356 }
  0xf4   :  { %v345_v24 = vpop.permute.xlu0 %344 }
  0xf7   :  { %v359_v33 = vpop.permute.xlu1 %358 }
  0xf8   :  { %v347_v28 = vpop.permute.xlu0 %346 }
 0x15b   :  { %v464_v27 = vpop.f32.mrb[0].mxu1 }
 0x15c   :  { %v321_v29 = vadd.f32 %v464_v27, %v428_v26  ;;  %v315_v30 = vpop.f32.mrb[1].mxu1 }
 0x15d   :  { %v316_v32 = vadd.f32 %v428_v26, %v315_v30 }
 0x15e   :  { %v335_v35 = vadd.f32 %v329_v17, %v321_v29  ;;  %v351_v37 = vadd.f32 %v347_v28, %v321_v29 }
 0x15f   :  { %v334_v38 = vadd.f32 %v328_v10, %v316_v32  ;;  %v350_v39 = vadd.f32 %v345_v24, %v316_v32 }
 0x160   :  { %v453_v40 = vpop.f32.mrb[0].mxu0  ;;  %v339_v41 = vadd.f32 %v337_v31, %v335_v35  ;;  %v363_v42 = vadd.f32 %v359_v33, %v351_v37 }
 0x161   :  { %v229_v43 = vadd.f32 %v453_v40, %v425_v34  ;;  %v223_v44 = vpop.f32.mrb[1].mxu0  ;;  %v338_v45 = vadd.f32 %v336_v36, %v334_v38  ;;  %v362_v46 = vadd.f32 %v357_v25, %v350_v39 }
 0x162   :  { %v224_v47 = vadd.f32 %v425_v34, %v223_v44  ;;  %341 = vst.msk [vmem:[#allocation15 + $0x8] sm:$0xff] %vm150_vm0, %v339_v41  ;;  %368 = vrot.lane.b32.xlu1 %v363_v42, %s739_s7 }
 0x163   :  { %v331_v48 = vmul.f32 0.35355338, %v229_v43  ;;  %340 = vst.msk [vmem:[#allocation15] sm:$0xff] %vm150_vm0, %v338_v45  ;;  %366 = vrot.lane.b32.xlu0 %v362_v46, %s739_s7 }
 0x164   :  { %v330_v49 = vmul.f32 0.35355338, %v224_v47 }
 0x165   :  { %333 = vst.msk [vmem:[#allocation14 + $0x8] sm:$0xff] %vm150_vm0, %v331_v48 }
 0x166   :  { %660 = shalt.err (!%p657_p4)
}
 0x167   :  { %s661_s26 = scalar_lea.hbm %s1017_s11, 256 }
 0x168   :  { %p662_p5 = scmp.ne.s32.totalorder %s1017_s11, %s661_s26  ;;  %p665_p6 = scmp.lt.u32.totalorder %s661_s26, %s1017_s11 }
 0x16a   :  { %p667_p7 = pnand %p665_p6, %p662_p5 }
 0x16c   :  { %670 = shalt.err (!%p667_p7)
}
 0x16d   :  { %397 = dma.vmem_to_hbm [thread:$0]  %s392_s2, 256, %s1017_s11, [#allocation16], %s729_s15, %s729_s15, %s730_s16   ;;  %332 = vst.msk [vmem:[#allocation14] sm:$0xff] %vm150_vm0, %v330_v49 }
 0x16e   :  { %s671_s4 = scalar_lea.vmem %s950_s20, 256  ;;  %p676_p9 = scmp.lt.s32.totalorder %s950_s20, %s950_s20 }
 0x16f   :  { %p672_p8 = scmp.ne.s32.totalorder %s950_s20, %s671_s4  ;;  %p677_p10 = scmp.lt.s32.totalorder %s671_s4, %s671_s4 }
 0x171   :  { %p678_p11 = por %p677_p10, %p676_p9 }
 0x173   :  { %p679_p12 = pnand %p678_p11, %p672_p8 }
 0x175   :  { %682 = shalt.err (!%p679_p12)
}
 0x176   :  { %s683_s29 = scalar_lea.hbm %s1016_s10, 256 }
 0x177   :  { %p684_p13 = scmp.ne.s32.totalorder %s1016_s10, %s683_s29  ;;  %p687_p0 = scmp.lt.u32.totalorder %s683_s29, %s1016_s10 }
 0x179   :  { %p689_p1 = pnand %p687_p0, %p684_p13 }
 0x17b   :  { %692 = shalt.err (!%p689_p1)
}
 0x17c   :  { %385 = dma.vmem_to_hbm [thread:$0]  %s950_s20, 256, %s1016_s10, [#allocation4], %s729_s15, %s729_s15, %s730_s16  }
 0x17d   :  { %s740_s30 = smov [#allocation17]  }
 0x17e   :  { %s403_s19 = sshll.u32 %s740_s30, 4  ;;  %s404_s19 = int_to_ptr.vmem [resolvable:$true] %s403_s19 }
 0x17f   :  { %s693_s21 = scalar_lea.vmem %s404_s19, 256  ;;  %p698_p3 = scmp.lt.s32.totalorder %s404_s19, %s404_s19 }
 0x180   :  { %p694_p2 = scmp.ne.s32.totalorder %s404_s19, %s693_s21  ;;  %p699_p4 = scmp.lt.s32.totalorder %s693_s21, %s693_s21 }
 0x182   :  { %p700_p5 = por %p699_p4, %p698_p3 }
 0x184   :  { %p701_p6 = pnand %p700_p5, %p694_p2 }
 0x1d4   :  { %v369_v50 = vpop.permute.xlu1 %368 }
 0x1d5   :  { %373 = vst.msk [vmem:[#allocation17 + $0x8] sm:$0xff] %vm150_vm0, %v369_v50  ;;  %v367_v51 = vpop.permute.xlu0 %366 }
 0x1d6   :  { %372 = vst.msk [vmem:[#allocation17] sm:$0xff] %vm150_vm0, %v367_v51 }
 0x1d7   :  { %704 = shalt.err (!%p701_p6)
}
 0x1d8   :  { %s705_s10 = scalar_lea.hbm %s1018_s12, 256 }
 0x1d9   :  { %p706_p7 = scmp.ne.s32.totalorder %s1018_s12, %s705_s10  ;;  %p709_p8 = scmp.lt.u32.totalorder %s705_s10, %s1018_s12 }
 0x1db   :  { %p711_p9 = pnand %p709_p8, %p706_p7 }
 0x1dd   :  { %714 = shalt.err (!%p711_p9)
}
 0x1de   :  { %409 = dma.vmem_to_hbm [thread:$0]  %s404_s19, 256, %s1018_s12, [#allocation16], %s729_s15, %s729_s15, %s730_s16  }
 0x1df   :  { %723 = dma.done.wait [#allocation4], 256  }
 0x1e0   :  { %724 = vsyncadd [#allocation4], 4294967040 }
 0x1e1   :  { %725 = dma.done.wait [#allocation16], 512  }
 0x1e2   :  { %726 = vsyncadd [#allocation16], 4294966784 }
 0x1e3   :  { %419 = vsyncpa [#allocation3], 1 }
 0x1e4   :  { %420 = vsyncpa [#allocation6], 1 }
 0x1e5   :  { %421 = vsyncpa [#allocation9], 1 }
 0x1e6   :  { %422 = vsyncpa [#allocation12], 1 }
 0x1e7   :  { %423 = vsyncpa [#allocation4], 1 }
 0x1e8   :  { %424 = vsyncpa [#allocation16], 1 }

</bundles_post_ra>
